<compile_context>
chip_gen: v7x
topology: tpu7x:2x2x1
jax: 0.10.0
libtpu: 0.0.40
codegen_flags: <defaults>
</compile_context>

<pallas_src>
import jax
import jax.numpy as jnp
from jax.experimental import pallas as pl
from jax.experimental.pallas import tpu as pltpu

VOCAB = 64        # vocab_size
EMBED = 32        # embedding_dim
HIDDEN = 32       # proj out_features (fixed to 32 in the module)
TOK_TILE = 8192   # tokens per grid step
CHUNK_ROWS = 512  # packed rows per inner compute chunk


def _round_up(n, m):
    return ((n + m - 1) // m) * m


def _block_diag(a, k):
    n, m = a.shape
    out = jnp.zeros((k * n, k * m), a.dtype)
    for j in range(k):
        out = out.at[j * n:(j + 1) * n, j * m:(j + 1) * m].set(a)
    return out


def _pick_pack():
    # 256-wide MXU (v6e / v7x): pack 4 tokens per 256-lane row; 128-wide MXU: pack 2.
    try:
        kind = jax.devices()[0].device_kind.lower()
    except Exception:
        return 2
    return 4 if ("v6" in kind or "v7" in kind or "7x" in kind) else 2


def _make_kernel(pack, chunk_rows, vocab):
    width = pack * vocab

    def kernel(ids_ref, ltab_ref, out_ref):
        # ids_ref : (R, pack) int32 — column j already offset by +j*V (wrapper fold)
        # ltab_ref: (pack*V, pack*V) f32 — block-diag of the folded logits table L
        # out_ref : (R, pack*V) f32 — lanes [j*V,(j+1)*V) = logits of token pack*row+j
        r = out_ref.shape[0]
        ltab = ltab_ref[...]                                               # hoisted
        lane = jax.lax.broadcasted_iota(jnp.int32, (chunk_rows, width), 1)  # hoisted
        n_chunks = r // chunk_rows

        @pl.loop(0, n_chunks)
        def _(c):
            i = pl.multiple_of(c * chunk_rows, chunk_rows)
            ids = ids_ref[pl.ds(i, chunk_rows), :]                 # (C, pack)
            tok = ids[:, pack - 1:pack]                            # (C, 1) -> bcast
            for j in range(pack - 2, -1, -1):
                tok = jnp.where(lane < (j + 1) * vocab, ids[:, j:j + 1], tok)
            one_hot = (lane == tok).astype(jnp.float32)            # (C, width) lane-dense
            out_ref[pl.ds(i, chunk_rows), :] = jnp.dot(
                one_hot, ltab, preferred_element_type=jnp.float32)

    return kernel


def word2vec_forward(ids, emb, wp, bp, wh, bh, *, tok_tile=TOK_TILE, pack=None):
    """ids: (B, S) int -> logits (B, S, V) f32.

    emb: (V, E); wp: (E, H); bp: (1, H); wh: (H, V); bh: (1, V)
    (wp / wh are the PyTorch Linear weights pre-transposed, so y = x @ W + b.)
    """
    B, S = ids.shape
    N = B * S
    V, _ = emb.shape
    if pack is None:
        pack = _pick_pack()

    # ---- maximal fold (tiny one-time XLA): logits depend only on the token id.
    ltab = jnp.maximum(emb @ wp + bp, 0.0) @ wh + bh                # (V, V)
    ltab_packed = _block_diag(ltab.astype(jnp.float32), pack)       # (pack*V, pack*V)

    # ---- tile so packed rows per grid step are a multiple of CHUNK_ROWS
    #      (or a single chunk for small N); rows always a multiple of 8.
    chunk_tokens = pack * CHUNK_ROWS
    row_tokens = pack * 8
    if N <= chunk_tokens:
        tile = _round_up(max(N, row_tokens), row_tokens)
        chunk_rows = tile // pack
    else:
        tok_tile_r = max(chunk_tokens, (tok_tile // chunk_tokens) * chunk_tokens)
        tile = min(tok_tile_r, _round_up(N, chunk_tokens))
        chunk_rows = CHUNK_ROWS
    Np = _round_up(N, tile)
    R = tile // pack
    width = pack * V

    # ---- pad ids (pad id 0; padded rows sliced away) and fold the +j*V offsets.
    ids_flat = ids.reshape(-1).astype(jnp.int32)
    if Np != N:
        ids_flat = jnp.concatenate([ids_flat, jnp.zeros((Np - N,), jnp.int32)])
    ids_mat = ids_flat.reshape(Np // pack, pack) + jnp.arange(pack, dtype=jnp.int32) * V

    out = pl.pallas_call(
        _make_kernel(pack, chunk_rows, V),
        out_shape=jax.ShapeDtypeStruct((Np // pack, width), jnp.float32),
        grid_spec=pltpu.PrefetchScalarGridSpec(
            num_scalar_prefetch=0,
            grid=(Np // tile,),
            in_specs=[
                pl.BlockSpec((R, pack), lambda i: (i, 0)),        # packed, offset ids
                pl.BlockSpec((width, width), lambda i: (0, 0)),   # folded logits table
            ],
            out_specs=pl.BlockSpec((R, width), lambda i: (i, 0)),
        ),
        compiler_params=pltpu.CompilerParams(
            dimension_semantics=("parallel",),
        ),
    )(ids_mat, ltab_packed)

    # (Np/pack, pack*V) row-major == (Np, V); drop padding, restore (B, S, V).
    return out.reshape(Np, V)[:N].reshape(B, S, V)


def reference_forward(ids, emb, wp, bp, wh, bh):
    x = emb[ids]                          # (B, S, E) embedding lookup
    h = jnp.maximum(x @ wp + bp, 0.0)     # (B, S, H)
    return h @ wh + bh                    # (B, S, V)


if __name__ == "__main__":
    key = jax.random.PRNGKey(0)
    k_ids, k_emb, k_wp, k_bp, k_wh, k_bh = jax.random.split(key, 6)

    # Parameters (shapes from Word2Vec.__init__), Linear weights pre-transposed.
    emb = jax.random.normal(k_emb, (VOCAB, EMBED), jnp.float32)                   # nn.Embedding
    wp = jax.random.normal(k_wp, (EMBED, HIDDEN), jnp.float32) / jnp.sqrt(EMBED)  # proj W^T
    bp = jax.random.normal(k_bp, (1, HIDDEN), jnp.float32) * 0.01                 # proj bias
    wh = jax.random.normal(k_wh, (HIDDEN, VOCAB), jnp.float32) / jnp.sqrt(HIDDEN) # head W^T
    bh = jax.random.normal(k_bh, (1, VOCAB), jnp.float32) * 0.01                  # head bias

    # Small-shape check (B=2, S=8): single grid step, single inner chunk.
    B, S = 2, 8
    ids = jax.random.randint(k_ids, (B, S), 0, VOCAB, dtype=jnp.int32)
    out = jax.block_until_ready(word2vec_forward(ids, emb, wp, bp, wh, bh))
    ref = reference_forward(ids, emb, wp, bp, wh, bh)
    assert out.shape == (B, S, VOCAB), out.shape
    assert jnp.allclose(out, ref, atol=1e-4, rtol=1e-4), "small-shape mismatch"

    # Larger check exercising the multi-chunk inner loop and a >1 'parallel' grid.
    B2, S2 = 2, 4200
    ids2 = jax.random.randint(k_ids, (B2, S2), 0, VOCAB, dtype=jnp.int32)
    out2 = jax.block_until_ready(word2vec_forward(ids2, emb, wp, bp, wh, bh))
    ref2 = reference_forward(ids2, emb, wp, bp, wh, bh)
    assert jnp.allclose(out2, ref2, atol=1e-4, rtol=1e-4), "large-shape mismatch"

    print("KERNEL_OK")
</pallas_src>

<mosaic_0001>
module attributes {stable_mosaic.version = 11 : i64} {
  func.func @kernel(%arg0: i32, %arg1: memref<8x2xi32, #tpu.memory_space<vmem>>, %arg2: memref<128x128xf32, #tpu.memory_space<vmem>>, %arg3: memref<8x128xf32, #tpu.memory_space<vmem>>) attributes {dimension_semantics = [#tpu.dimension_semantics<parallel>], iteration_bounds = array<i64: 1>, scalar_prefetch = 0 : i64, scratch_operands = 0 : i64, tpu.core_type = #tpu.core_type<tc>, window_params = [{transform_indices = @transform_0, window_bounds = array<i64: 8, 2>}, {pipeline_mode = #tpu.pipeline_mode<synchronous>, transform_indices = @transform_1, window_bounds = array<i64: 128, 128>}, {transform_indices = @transform_2, window_bounds = array<i64: 8, 128>}]} {
    %c0 = arith.constant 0 : index
    %c0_0 = arith.constant 0 : index
    %0 = vector.load %arg2[%c0, %c0_0] : memref<128x128xf32, #tpu.memory_space<vmem>>, vector<128x128xf32>
    %1 = tpu.iota {dimensions = array<i32: 1>} : vector<8x128xi32>
    %c0_i32 = arith.constant 0 : i32
    %c1_i32 = arith.constant 1 : i32
    %2 = arith.muli %c0_i32, %c1_i32 : i32
    %c0_i32_1 = arith.constant 0 : i32
    %3 = arith.addi %c0_i32_1, %2 : i32
    %c8_i32 = arith.constant 8 : i32
    %4 = arith.muli %3, %c8_i32 : i32
    %5 = tpu.assume_multiple %4, 8 : i32
    %6 = arith.index_cast %5 : i32 to index
    %c0_2 = arith.constant 0 : index
    %7 = vector.load %arg1[%6, %c0_2] : memref<8x2xi32, #tpu.memory_space<vmem>>, vector<8x2xi32>
    %8 = vector.extract_strided_slice %7 {offsets = [0, 1], sizes = [8, 1], strides = [1, 1]} : vector<8x2xi32> to vector<8x1xi32>
    %c64_i32 = arith.constant 64 : i32
    %9 = vector.broadcast %c64_i32 : i32 to vector<8x128xi32>
    %10 = arith.cmpi slt, %1, %9 : vector<8x128xi32>
    %11 = vector.extract_strided_slice %7 {offsets = [0, 0], sizes = [8, 1], strides = [1, 1]} : vector<8x2xi32> to vector<8x1xi32>
    %12 = vector.shape_cast %11 : vector<8x1xi32> to vector<8x1xi32>
    %13 = vector.broadcast %12 : vector<8x1xi32> to vector<8x128xi32>
    %14 = vector.shape_cast %8 : vector<8x1xi32> to vector<8x1xi32>
    %15 = vector.broadcast %14 : vector<8x1xi32> to vector<8x128xi32>
    %16 = arith.select %10, %13, %15 : vector<8x128xi1>, vector<8x128xi32>
    %17 = arith.cmpi eq, %1, %16 : vector<8x128xi32>
    %18 = arith.extui %17 : vector<8x128xi1> to vector<8x128xi32>
    %19 = arith.sitofp %18 : vector<8x128xi32> to vector<8x128xf32>
    %cst = arith.constant dense<0.000000e+00> : vector<8x128xf32>
    %20 = tpu.matmul %19, %0, %cst {dimension_numbers = #tpu.dot_dimension_numbers<[1], [0], [0], [1], [0, 0, 1, 1], [], []>} : vector<8x128xf32>, vector<128x128xf32>, vector<8x128xf32> -> vector<8x128xf32>
    %21 = arith.index_cast %5 : i32 to index
    %c0_3 = arith.constant 0 : index
    %22 = vector.load %arg3[%21, %c0_3] : memref<8x128xf32, #tpu.memory_space<vmem>>, vector<8x128xf32>
    tpu.vector_store %arg3[%21, %c0_3], %20 {strides = array<i32>} : memref<8x128xf32, #tpu.memory_space<vmem>>, vector<8x128xf32>,
    %c1_i32_4 = arith.constant 1 : i32
    return
  }
  func.func @transform_0(%arg0: i32) -> (i32, i32) {
    %c0_i32 = arith.constant 0 : i32
    %c0_i32_0 = arith.constant 0 : i32
    return %arg0, %c0_i32 : i32, i32
  }
  func.func @transform_1(%arg0: i32) -> (i32, i32) {
    %c0_i32 = arith.constant 0 : i32
    %c0_i32_0 = arith.constant 0 : i32
    %c0_i32_1 = arith.constant 0 : i32
    return %c0_i32, %c0_i32_0 : i32, i32
  }
  func.func @transform_2(%arg0: i32) -> (i32, i32) {
    %c0_i32 = arith.constant 0 : i32
    %c0_i32_0 = arith.constant 0 : i32
    return %arg0, %c0_i32 : i32, i32
  }
}

</mosaic_0001>

<bundles_post_ra>
// kernel: tpu_custom_call.1
= control target key start
LH: loop header
LB: loop body
LE: loop exit
PB: predicated region body
PF: predicated region fallthrough
CT: control target
= control target key end

     0   :  { %7 = vsyncpa [#allocation3], 0  ;;  %s332_s0 = inlined_call_operand.vmem [shape: s32[8,2], index: 0, kind: input, shape index: {}]   ;;  %s333_s1 = inlined_call_operand.hbm [shape: f32[128,128], index: 1, kind: input, shape index: {}]   ;;  %s334_s2 = inlined_call_operand.hbm [shape: f32[8,128], index: 2, kind: output, shape index: {}]  }
   0x1   :  { %8 = vsyncpa [#allocation4], 0  ;;  %s280_s9 = smov [#allocation2]   ;;  %s232_s13 = scalar_lea.hbm %s333_s1, 2048 }
   0x2   :  { %s16_s10 = sshll.u32 %s280_s9, 4  ;;  %p233_p0 = scmp.ne.s32.totalorder %s333_s1, %s232_s13  ;;  %s17_s10 = int_to_ptr.vmem [resolvable:$true] %s16_s10 }
   0x3   :  { %p236_p1 = scmp.lt.u32.totalorder %s232_s13, %s333_s1 }
   0x5   :  { %p238_p2 = pnand %p236_p1, %p233_p0 }
   0x7   :  { %241 = shalt.err (!%p238_p2)
}
   0x8   :  { %s242_s18 = scalar_lea.vmem %s17_s10, 2048  ;;  %p247_p4 = scmp.lt.s32.totalorder %s17_s10, %s17_s10 }
   0x9   :  { %p243_p3 = scmp.ne.s32.totalorder %s17_s10, %s242_s18  ;;  %p248_p5 = scmp.lt.s32.totalorder %s242_s18, %s242_s18 }
   0xb   :  { %p249_p6 = por %p248_p5, %p247_p4 }
   0xd   :  { %p250_p7 = pnand %p249_p6, %p243_p3 }
   0xf   :  { %253 = shalt.err (!%p250_p7)
}
  0x10   :  { %s281_s19 = smov 128   ;;  %s282_s20 = smov 8  }
  0x11   :  { %22 = dma.hbm_to_vmem [thread:$0]  %s333_s1, 2048, %s17_s10, [#allocation3], %s281_s19, %s281_s19, %s282_s20  }
  0x12   :  { %276 = dma.done.wait [#allocation3], 2048  }
  0x13   :  { %277 = vsyncadd [#allocation3], 4294965248  ;;  %v283_v0 = vmov 0   ;;  %v284_v1 = vmov 0.0|0.0   ;;  %v44_v2 = vld [vmem:[%s332_s0] sm:$0xff]  ;;  %v27_v4 = vld [vmem:[#allocation2 + $0x8] sm:$0xff]  ;;  %v42_v29 = vlaneseq }
  0x14   :  { %230 = vset.pattern.permute.xlu0 %v283_v0  ;;  %196 = vmatprep.subr.bf16.mxu0 %v284_v1  ;;  %v26_v3 = vld [vmem:[#allocation2] sm:$0xff]  ;;  %v28_v6 = vld [vmem:[#allocation2 + $0x10] sm:$0xff]  ;;  %v29_v7 = vld [vmem:[#allocation2 + $0x18] sm:$0xff]  ;;  %v285_v11 = vmov 1   ;;  %vm286_vm0 = vmmov 0   ;;  %v287_v13 = vmov 0.0  }
  0x15   :  { %47 = vperm.xlu0 %230, %v44_v2   ;;  %v197_v5 = vpack.c.bf16 %v27_v4, %v26_v3  ;;  %v200_v8 = vpack.c.bf16 %v29_v7, %v28_v6  ;;  %v30_v9 = vld [vmem:[#allocation2 + $0x20] sm:$0xff]  ;;  %v31_v10 = vld [vmem:[#allocation2 + $0x28] sm:$0xff]  ;;  %193 = vmatprep.mubr.msk.f32.mxu0 %vm286_vm0, %v287_v13  ;;  %v32_v14 = vld [vmem:[#allocation2 + $0x30] sm:$0xff]  ;;  %v43_v30 = vand.u32 127, %v42_v29  ;;  %v288_v34 = vmov 1.0   ;;  %s289_s0 = smov [#allocation5]  }
  0x16   :  { %v203_v12 = vpack.c.bf16 %v31_v10, %v30_v9  ;;  %v33_v15 = vld [vmem:[#allocation2 + $0x38] sm:$0xff]  ;;  %v34_v17 = vld [vmem:[#allocation2 + $0x40] sm:$0xff]  ;;  %v35_v18 = vld [vmem:[#allocation2 + $0x48] sm:$0xff]  ;;  %s133_s1 = sshll.u32 %s289_s0, 4  ;;  %s134_s1 = int_to_ptr.vmem [resolvable:$true] %s133_s1 }
  0x17   :  { %198 = vmatpush3.bf16.msra.mxu0 %v197_v5  ;;  %v206_v16 = vpack.c.bf16 %v33_v15, %v32_v14  ;;  %v209_v19 = vpack.c.bf16 %v35_v18, %v34_v17  ;;  %v36_v20 = vld [vmem:[#allocation2 + $0x50] sm:$0xff]  ;;  %v37_v21 = vld [vmem:[#allocation2 + $0x58] sm:$0xff]  ;;  %v38_v23 = vld [vmem:[#allocation2 + $0x60] sm:$0xff]  ;;  %vm45_vm1 = vcmp.lt.s32.totalorder %v43_v30, 64  ;;  %s254_s25 = scalar_lea.vmem %s134_s1, 128  ;;  %p259_p9 = scmp.lt.s32.totalorder %s134_s1, %s134_s1 }
  0x18   :  { %199 = vmatprep.subr.bf16.mxu0 %v284_v1  ;;  %v212_v22 = vpack.c.bf16 %v37_v21, %v36_v20  ;;  %v39_v24 = vld [vmem:[#allocation2 + $0x68] sm:$0xff]  ;;  %v40_v26 = vld [vmem:[#allocation2 + $0x70] sm:$0xff]  ;;  %v41_v27 = vld [vmem:[#allocation2 + $0x78] sm:$0xff]  ;;  %p255_p8 = scmp.ne.s32.totalorder %s134_s1, %s254_s25  ;;  %p260_p10 = scmp.lt.s32.totalorder %s254_s25, %s254_s25 }
  0x19   :  { %231 = vset.pattern.permute.xlu0 %v285_v11  ;;  %v215_v25 = vpack.c.bf16 %v39_v24, %v38_v23  ;;  %v218_v28 = vpack.c.bf16 %v41_v27, %v40_v26 }
  0x1a   :  { %50 = vperm.xlu0 %231, %v44_v2   ;;  %p261_p11 = por %p260_p10, %p259_p9 }
  0x1b   :  { %201 = vmatpush3.bf16.msra.mxu0 %v200_v8 }
  0x1c   :  { %202 = vmatprep.subr.bf16.mxu0 %v284_v1  ;;  %p262_p12 = pnand %p261_p11, %p255_p8 }
  0x1f   :  { %204 = vmatpush3.bf16.msra.mxu0 %v203_v12 }
  0x20   :  { %205 = vmatprep.subr.bf16.mxu0 %v284_v1 }
  0x23   :  { %207 = vmatpush3.bf16.msra.mxu0 %v206_v16 }
  0x24   :  { %208 = vmatprep.subr.bf16.mxu0 %v284_v1 }
  0x27   :  { %210 = vmatpush3.bf16.msra.mxu0 %v209_v19 }
  0x28   :  { %211 = vmatprep.subr.bf16.mxu0 %v284_v1 }
  0x2b   :  { %213 = vmatpush3.bf16.msra.mxu0 %v212_v22 }
  0x2c   :  { %214 = vmatprep.subr.bf16.mxu0 %v284_v1 }
  0x2f   :  { %216 = vmatpush3.bf16.msra.mxu0 %v215_v25 }
  0x30   :  { %217 = vmatprep.subr.bf16.mxu0 %v284_v1 }
  0x33   :  { %219 = vmatpush3.bf16.msra.mxu0 %v218_v28 }
  0x94   :  { %v48_v31 = vpop.permute.xlu0 %47 }
  0x99   :  { %v51_v32 = vpop.permute.xlu0 %50 }
  0x9a   :  { %v52_v33 = vsel %vm45_vm1, %v48_v31, %v51_v32 }
  0x9b   :  { %vm53_vm2 = vcmp.eq.s32.totalorder %v43_v30, %v52_v33 }
  0x9c   :  { %194 = vmatmul.mubr.msk.f32.vlgmr.msra.gmra.mrb[0].mxu0 %vm53_vm2, %v288_v34 }
 0x16f   :  { %v122_v35 = vpop.f32.mrb[0].mxu0 }
 0x170   :  { %126 = vst [vmem:[#allocation5] sm:$0xff] %v122_v35  ;;  %v195_v36 = vpop.f32.mrb[1].mxu0 }
 0x171   :  { %265 = shalt.err (!%p262_p12)
}
 0x172   :  { %s266_s28 = scalar_lea.hbm %s334_s2, 128 }
 0x173   :  { %p267_p13 = scmp.ne.s32.totalorder %s334_s2, %s266_s28  ;;  %p270_p0 = scmp.lt.u32.totalorder %s266_s28, %s334_s2 }
 0x175   :  { %p272_p1 = pnand %p270_p0, %p267_p13 }
 0x177   :  { %275 = shalt.err (!%p272_p1)
}
 0x178   :  { %136 = dma.vmem_to_hbm [thread:$0]  %s134_s1, 128, %s334_s2, [#allocation4]  }
 0x179   :  { %278 = dma.done.wait [#allocation4], 128  }
 0x17a   :  { %279 = vsyncadd [#allocation4], 4294967168 }
 0x17b   :  { %140 = vsyncpa [#allocation3], 1 }
 0x17c   :  { %141 = vsyncpa [#allocation4], 1 }

</bundles_post_ra>
